<compile_context>
chip_gen: v7x
topology: tpu7x:2x2x1
jax: 0.10.0
libtpu: 0.0.40
codegen_flags: <defaults>
</compile_context>

<pallas_src>
import jax
import jax.numpy as jnp
from jax.experimental import pallas as pl
from jax.experimental.pallas import tpu as pltpu

_LANES = 128
_SUBLANES = 8
_TARGET_BLOCK_BYTES = 4 * 1024 * 1024  # per input, per grid step


def _round_up(x, m):
    return ((x + m - 1) // m) * m


def _device_defaults():
    """(n_splits, vmem_limit_bytes) chosen by TPU generation."""
    kind = ""
    try:
        kind = jax.devices()[0].device_kind.lower()
    except Exception:
        pass
    if "v7" in kind:
        # 2 TensorCores/chip, only 64 MiB VMEM per core -> keep footprint small.
        return 2, 32 * 1024 * 1024
    # v5e / v6e (single TensorCore, 128 MiB physical VMEM): raise the default
    # 16/32 MiB scoped limit so the 16 MiB of double-buffered inputs fits.
    return 1, 64 * 1024 * 1024


def _make_mse_kernel(n_valid_rows, tile_rows, full_tiles):
    """Kernel accumulating per-(sublane,lane) partial sums of (pred-targ)^2."""

    def kernel(pred_ref, targ_ref, out_ref):
        c = pl.program_id(0)        # split axis (both TCs on v7x)
        i = pl.program_id(1)        # reduction steps within this split
        steps = pl.num_programs(1)

        @pl.when(i == 0)
        def _():
            out_ref[...] = jnp.zeros_like(out_ref)

        d = pred_ref[...].astype(jnp.float32) - targ_ref[...].astype(jnp.float32)
        sq = d * d

        def fold(x):
            # (tile_rows, 128) -> (8, 128): pure VPU sublane adds, no XLU work.
            return x.reshape(tile_rows // _SUBLANES, _SUBLANES, _LANES).sum(axis=0)

        logical_tile = c * steps + i

        # Fast path: interior tiles are fully valid -- no iota / compare / select.
        @pl.when(logical_tile < full_tiles)
        def _():
            out_ref[...] += fold(sq)

        # Slow path: last (partial) tile and clamped duplicate tiles only.
        # row_ids are int32: overflows only beyond ~2^31 rows (~2.7e11 elements),
        # far past HBM capacity.
        @pl.when(logical_tile >= full_tiles)
        def _():
            row_ids = logical_tile * tile_rows + jax.lax.broadcasted_iota(
                jnp.int32, sq.shape, 0
            )
            out_ref[...] += fold(jnp.where(row_ids < n_valid_rows, sq, 0.0))

    return kernel


def weighted_mse_loss(affs_prediction, affs_target, *, tile_rows=None, n_splits=None):
    assert affs_prediction.shape == affs_target.shape
    n_elems = affs_prediction.size

    pred_flat = jnp.reshape(affs_prediction, (-1,))   # free reshape, native dtype
    targ_flat = jnp.reshape(affs_target, (-1,))

    itemsize = jnp.dtype(pred_flat.dtype).itemsize
    # Packed sublane multiple of the input dtype: 8 rows for 4-byte, 16 for
    # 2-byte, 32 for 1-byte types.
    sub = max(_SUBLANES, 32 // max(itemsize, 1))

    # Align the flat length to a full (sub x 128) row group so every block shape
    # is legal and the in-kernel fold reshape is exact.  Zeros contribute 0 to
    # the sum; the mean divides by the true element count.
    # TODO(synk): a fully copy-free ragged path would need 1-D blocks / manual
    # DMA; the pad copy only happens when n_elems % (sub*128) != 0.
    align = sub * _LANES
    rem = n_elems % align
    if rem:
        pad = align - rem
        pred_flat = jnp.pad(pred_flat, (0, pad))
        targ_flat = jnp.pad(targ_flat, (0, pad))

    rows = pred_flat.size // _LANES
    pred2d = pred_flat.reshape(rows, _LANES)
    targ2d = targ_flat.reshape(rows, _LANES)

    default_splits, vmem_limit = _device_defaults()
    splits = default_splits if n_splits is None else n_splits

    # Dtype-aware tile: ~4 MiB per input per grid step (8192 f32 / 16384 bf16 /
    # 32768 int8 rows), never exceeding the array.
    if tile_rows is None:
        tile_rows = _TARGET_BLOCK_BYTES // (_LANES * itemsize)
    tile = min(_round_up(tile_rows, sub), rows)

    tiles_total = pl.cdiv(rows, tile)
    if tiles_total < splits:
        splits = 1
    steps = pl.cdiv(tiles_total, splits)
    full_tiles = rows // tile   # tiles whose rows are all inside the array

    def in_map(c, i):
        # Clamp so the DMA never targets a fully out-of-bounds block; clamped
        # duplicate tiles are zeroed by the in-kernel row mask.
        return (jnp.minimum(c * steps + i, tiles_total - 1), 0)

    kernel = _make_mse_kernel(rows, tile, full_tiles)

    out_bytes = splits * _SUBLANES * _LANES * 4

    partials = pl.pallas_call(
        kernel,
        out_shape=jax.ShapeDtypeStruct((splits * _SUBLANES, _LANES), jnp.float32),
        grid_spec=pltpu.PrefetchScalarGridSpec(
            num_scalar_prefetch=0,
            grid=(splits, steps),
            in_specs=[
                pl.BlockSpec((tile, _LANES), in_map),
                pl.BlockSpec((tile, _LANES), in_map),
            ],
            # Constant block index along the reduction axis -> VMEM-resident
            # accumulator, no scratch and no epilogue copy.
            out_specs=pl.BlockSpec((_SUBLANES, _LANES), lambda c, i: (c, 0)),
        ),
        compiler_params=pltpu.CompilerParams(
            # TODO(synk): on v7x verify PARALLEL actually core-shards the split
            # axis; if not, switch that axis to pltpu.CORE_PARALLEL.
            dimension_semantics=("parallel", "arbitrary"),
            vmem_limit_bytes=vmem_limit,
        ),
        cost_estimate=pl.CostEstimate(
            flops=3 * n_elems,
            transcendentals=0,
            bytes_accessed=2 * n_elems * itemsize + out_bytes,
        ),
    )(pred2d, targ2d)

    # Single tiny cross-lane reduce + mean over the *true* element count.
    return (jnp.sum(partials) / jnp.float32(n_elems)).astype(jnp.float32)


if __name__ == "__main__":
    key = jax.random.PRNGKey(0)
    k1, k2 = jax.random.split(key)
    # NCHW, small shapes
    pred = jax.random.normal(k1, (2, 4, 16, 16), dtype=jnp.float32)
    targ = jax.random.normal(k2, (2, 4, 16, 16), dtype=jnp.float32)

    loss = weighted_mse_loss(pred, targ)
    jax.block_until_ready(loss)

    # sanity check against pure-JAX reference (summation order differs slightly)
    ref = jnp.mean((pred - targ) ** 2)
    assert jnp.allclose(loss, ref, rtol=1e-5, atol=1e-6), (loss, ref)

    print("KERNEL_OK")
</pallas_src>

<mosaic_0001>
module attributes {stable_mosaic.version = 11 : i64} {
  func.func @kernel(%arg0: i32, %arg1: i32, %arg2: memref<16x128xf32, #tpu.memory_space<vmem>>, %arg3: memref<16x128xf32, #tpu.memory_space<vmem>>, %arg4: memref<8x128xf32, #tpu.memory_space<vmem>>) attributes {dimension_semantics = [#tpu.dimension_semantics<parallel>, #tpu.dimension_semantics<arbitrary>], iteration_bounds = array<i64: 1, 1>, scalar_prefetch = 0 : i64, scratch_operands = 0 : i64, tpu.core_type = #tpu.core_type<tc>, window_params = [{transform_indices = @transform_0, window_bounds = array<i64: 16, 128>}, {transform_indices = @transform_1, window_bounds = array<i64: 16, 128>}, {transform_indices = @transform_2, window_bounds = array<i64: 8, 128>}]} {
    %c0_i32 = arith.constant 0 : i32
    %0 = arith.cmpi eq, %arg1, %c0_i32 : i32
    %1 = arith.extui %0 : i1 to i32
    %c0_i32_0 = arith.constant 0 : i32
    %2 = arith.cmpi ne, %1, %c0_i32_0 : i32
    scf.if %2 {
      %cst = arith.constant 0.000000e+00 : f32
      %15 = vector.broadcast %cst : f32 to vector<8x128xf32>
      %c0_8 = arith.constant 0 : index
      %c0_9 = arith.constant 0 : index
      %16 = vector.load %arg4[%c0_8, %c0_9] : memref<8x128xf32, #tpu.memory_space<vmem>>, vector<8x128xf32>
      tpu.vector_store %arg4[%c0_8, %c0_9], %15 {strides = array<i32>} : memref<8x128xf32, #tpu.memory_space<vmem>>, vector<8x128xf32>,
    } else {
    }
    %c0 = arith.constant 0 : index
    %c0_1 = arith.constant 0 : index
    %3 = vector.load %arg2[%c0, %c0_1] : memref<16x128xf32, #tpu.memory_space<vmem>>, vector<16x128xf32>
    %c0_2 = arith.constant 0 : index
    %c0_3 = arith.constant 0 : index
    %4 = vector.load %arg3[%c0_2, %c0_3] : memref<16x128xf32, #tpu.memory_space<vmem>>, vector<16x128xf32>
    %5 = arith.subf %3, %4 : vector<16x128xf32>
    %6 = arith.mulf %5, %5 : vector<16x128xf32>
    %c1_i32 = arith.constant 1 : i32
    %7 = arith.muli %arg0, %c1_i32 : i32
    %8 = arith.addi %7, %arg1 : i32
    %c1_i32_4 = arith.constant 1 : i32
    %9 = arith.cmpi slt, %8, %c1_i32_4 : i32
    %10 = arith.extui %9 : i1 to i32
    %c0_i32_5 = arith.constant 0 : i32
    %11 = arith.cmpi ne, %10, %c0_i32_5 : i32
    scf.if %11 {
      %c0_8 = arith.constant 0 : index
      %c0_9 = arith.constant 0 : index
      %15 = vector.load %arg4[%c0_8, %c0_9] : memref<8x128xf32, #tpu.memory_space<vmem>>, vector<8x128xf32>
      %16 = vector.shape_cast %6 : vector<16x128xf32> to vector<2x8x128xf32>
      %cst = arith.constant dense<0.000000e+00> : vector<8x128xf32>
      %17 = vector.multi_reduction <add>, %16, %cst [0] : vector<2x8x128xf32> to vector<8x128xf32>
      %18 = arith.addf %15, %17 : vector<8x128xf32>
      %c0_10 = arith.constant 0 : index
      %c0_11 = arith.constant 0 : index
      %19 = vector.load %arg4[%c0_10, %c0_11] : memref<8x128xf32, #tpu.memory_space<vmem>>, vector<8x128xf32>
      tpu.vector_store %arg4[%c0_10, %c0_11], %18 {strides = array<i32>} : memref<8x128xf32, #tpu.memory_space<vmem>>, vector<8x128xf32>,
    } else {
    }
    %c1_i32_6 = arith.constant 1 : i32
    %12 = arith.cmpi sge, %8, %c1_i32_6 : i32
    %13 = arith.extui %12 : i1 to i32
    %c0_i32_7 = arith.constant 0 : i32
    %14 = arith.cmpi ne, %13, %c0_i32_7 : i32
    scf.if %14 {
      %c16_i32 = arith.constant 16 : i32
      %15 = arith.muli %8, %c16_i32 : i32
      %16 = tpu.iota {dimensions = array<i32: 0>} : vector<16x128xi32>
      %17 = vector.broadcast %15 : i32 to vector<16x128xi32>
      %18 = arith.addi %17, %16 : vector<16x128xi32>
      %c0_8 = arith.constant 0 : index
      %c0_9 = arith.constant 0 : index
      %19 = vector.load %arg4[%c0_8, %c0_9] : memref<8x128xf32, #tpu.memory_space<vmem>>, vector<8x128xf32>
      %c16_i32_10 = arith.constant 16 : i32
      %20 = vector.broadcast %c16_i32_10 : i32 to vector<16x128xi32>
      %21 = arith.cmpi slt, %18, %20 : vector<16x128xi32>
      %cst = arith.constant 0.000000e+00 : f32
      %22 = vector.broadcast %cst : f32 to vector<16x128xf32>
      %23 = arith.select %21, %6, %22 : vector<16x128xi1>, vector<16x128xf32>
      %24 = vector.shape_cast %23 : vector<16x128xf32> to vector<2x8x128xf32>
      %cst_11 = arith.constant dense<0.000000e+00> : vector<8x128xf32>
      %25 = vector.multi_reduction <add>, %24, %cst_11 [0] : vector<2x8x128xf32> to vector<8x128xf32>
      %26 = arith.addf %19, %25 : vector<8x128xf32>
      %c0_12 = arith.constant 0 : index
      %c0_13 = arith.constant 0 : index
      %27 = vector.load %arg4[%c0_12, %c0_13] : memref<8x128xf32, #tpu.memory_space<vmem>>, vector<8x128xf32>
      tpu.vector_store %arg4[%c0_12, %c0_13], %26 {strides = array<i32>} : memref<8x128xf32, #tpu.memory_space<vmem>>, vector<8x128xf32>,
    } else {
    }
    return
  }
  func.func @transform_0(%arg0: i32, %arg1: i32) -> (i32, i32) {
    %c1_i32 = arith.constant 1 : i32
    %0 = arith.muli %arg0, %c1_i32 : i32
    %1 = arith.addi %0, %arg1 : i32
    %c0_i32 = arith.constant 0 : i32
    %2 = arith.minsi %1, %c0_i32 : i32
    %c0_i32_0 = arith.constant 0 : i32
    %c0_i32_1 = arith.constant 0 : i32
    return %2, %c0_i32_0 : i32, i32
  }
  func.func @transform_1(%arg0: i32, %arg1: i32) -> (i32, i32) {
    %c1_i32 = arith.constant 1 : i32
    %0 = arith.muli %arg0, %c1_i32 : i32
    %1 = arith.addi %0, %arg1 : i32
    %c0_i32 = arith.constant 0 : i32
    %2 = arith.minsi %1, %c0_i32 : i32
    %c0_i32_0 = arith.constant 0 : i32
    %c0_i32_1 = arith.constant 0 : i32
    return %2, %c0_i32_0 : i32, i32
  }
  func.func @transform_2(%arg0: i32, %arg1: i32) -> (i32, i32) {
    %c0_i32 = arith.constant 0 : i32
    %c0_i32_0 = arith.constant 0 : i32
    return %arg0, %c0_i32 : i32, i32
  }
}

</mosaic_0001>

<bundles_post_ra>
// kernel: tpu_custom_call.1
= control target key start
LH: loop header
LB: loop body
LE: loop exit
PB: predicated region body
PF: predicated region fallthrough
CT: control target
= control target key end

     0   :  { %7 = vsyncpa [#allocation3], 0  ;;  %s255_s0 = inlined_call_operand.hbm [shape: f32[16,128], index: 0, kind: input, shape index: {}]   ;;  %s256_s1 = inlined_call_operand.hbm [shape: f32[16,128], index: 1, kind: input, shape index: {}]   ;;  %s257_s2 = inlined_call_operand.hbm [shape: f32[8,128], index: 2, kind: output, shape index: {}]  }
   0x1   :  { %8 = vsyncpa [#allocation6], 0 }
   0x2   :  { %9 = vsyncpa [#allocation4], 0  ;;  %s199_s9 = smov [#allocation2]   ;;  %s127_s13 = scalar_lea.hbm %s255_s0, 256 }
   0x3   :  { %s21_s10 = sshll.u32 %s199_s9, 4  ;;  %p128_p0 = scmp.ne.s32.totalorder %s255_s0, %s127_s13  ;;  %s22_s10 = int_to_ptr.vmem [resolvable:$true] %s21_s10 }
   0x4   :  { %p131_p1 = scmp.lt.u32.totalorder %s127_s13, %s255_s0 }
   0x6   :  { %p133_p2 = pnand %p131_p1, %p128_p0 }
   0x8   :  { %136 = shalt.err (!%p133_p2)
}
   0x9   :  { %s137_s18 = scalar_lea.vmem %s22_s10, 256  ;;  %p142_p4 = scmp.lt.s32.totalorder %s22_s10, %s22_s10 }
   0xa   :  { %p138_p3 = scmp.ne.s32.totalorder %s22_s10, %s137_s18  ;;  %p143_p5 = scmp.lt.s32.totalorder %s137_s18, %s137_s18 }
   0xc   :  { %p144_p6 = por %p143_p5, %p142_p4 }
   0xe   :  { %p145_p7 = pnand %p144_p6, %p138_p3 }
  0x10   :  { %148 = shalt.err (!%p145_p7)
}
  0x11   :  { %s200_s19 = smov 128   ;;  %s201_s20 = smov 8  }
  0x12   :  { %27 = dma.hbm_to_vmem [thread:$0]  %s255_s0, 256, %s22_s10, [#allocation3], %s200_s19, %s200_s19, %s201_s20  }
  0x13   :  { %s202_s23 = smov [#allocation5]   ;;  %s149_s27 = scalar_lea.hbm %s256_s1, 256 }
  0x14   :  { %s39_s24 = sshll.u32 %s202_s23, 4  ;;  %p150_p8 = scmp.ne.s32.totalorder %s256_s1, %s149_s27  ;;  %s40_s24 = int_to_ptr.vmem [resolvable:$true] %s39_s24 }
  0x15   :  { %p153_p9 = scmp.lt.u32.totalorder %s149_s27, %s256_s1 }
  0x17   :  { %p155_p10 = pnand %p153_p9, %p150_p8 }
  0x19   :  { %158 = shalt.err (!%p155_p10)
}
  0x1a   :  { %s159_s4 = scalar_lea.vmem %s40_s24, 256  ;;  %p164_p12 = scmp.lt.s32.totalorder %s40_s24, %s40_s24 }
  0x1b   :  { %p160_p11 = scmp.ne.s32.totalorder %s40_s24, %s159_s4  ;;  %p165_p13 = scmp.lt.s32.totalorder %s159_s4, %s159_s4 }
  0x1d   :  { %p166_p0 = por %p165_p13, %p164_p12 }
  0x1f   :  { %p167_p1 = pnand %p166_p0, %p160_p11 }
  0x21   :  { %170 = shalt.err (!%p167_p1)
}
  0x22   :  { %45 = dma.hbm_to_vmem [thread:$0]  %s256_s1, 256, %s40_s24, [#allocation6], %s200_s19, %s200_s19, %s201_s20  }
  0x23   :  { %193 = dma.done.wait [#allocation3], 256  }
  0x24   :  { %194 = vsyncadd [#allocation3], 4294967040 }
  0x25   :  { %195 = dma.done.wait [#allocation6], 256  }
  0x26   :  { %196 = vsyncadd [#allocation6], 4294967040  ;;  %v65_v0 = vld [vmem:[#allocation2] sm:$0xff]  ;;  %v66_v1 = vld [vmem:[#allocation2 + $0x8] sm:$0xff]  ;;  %s203_s6 = smov [#allocation7]  }
  0x27   :  { %v67_v2 = vld [vmem:[#allocation5] sm:$0xff]  ;;  %v68_v3 = vld [vmem:[#allocation5 + $0x8] sm:$0xff]  ;;  %s107_s7 = sshll.u32 %s203_s6, 4  ;;  %s108_s7 = int_to_ptr.vmem [resolvable:$true] %s107_s7 }
  0x28   :  { %v69_v4 = vsub.f32 %v65_v0, %v67_v2  ;;  %v70_v5 = vsub.f32 %v66_v1, %v68_v3  ;;  %s171_s8 = scalar_lea.vmem %s108_s7, 128  ;;  %p176_p3 = scmp.lt.s32.totalorder %s108_s7, %s108_s7 }
  0x29   :  { %p172_p2 = scmp.ne.s32.totalorder %s108_s7, %s171_s8  ;;  %p177_p4 = scmp.lt.s32.totalorder %s171_s8, %s171_s8 }
  0x2a   :  { %v71_v6 = vmul.f32 %v69_v4, %v69_v4  ;;  %v72_v7 = vmul.f32 %v70_v5, %v70_v5 }
  0x2b   :  { %p178_p5 = por %p177_p4, %p176_p3 }
  0x2c   :  { %v79_v8 = vadd.f32 %v72_v7, %v71_v6 }
  0x2d   :  { %p179_p6 = pnand %p178_p5, %p172_p2 }
  0x2e   :  { %81 = vst [vmem:[#allocation7] sm:$0xff] %v79_v8 }
  0x2f   :  { %182 = shalt.err (!%p179_p6)
}
  0x30   :  { %s183_s10 = scalar_lea.hbm %s257_s2, 128 }
  0x31   :  { %p184_p7 = scmp.ne.s32.totalorder %s257_s2, %s183_s10  ;;  %p187_p8 = scmp.lt.u32.totalorder %s183_s10, %s257_s2 }
  0x33   :  { %p189_p9 = pnand %p187_p8, %p184_p7 }
  0x35   :  { %192 = shalt.err (!%p189_p9)
}
  0x36   :  { %110 = dma.vmem_to_hbm [thread:$0]  %s108_s7, 128, %s257_s2, [#allocation4]  }
  0x37   :  { %197 = dma.done.wait [#allocation4], 128  }
  0x38   :  { %198 = vsyncadd [#allocation4], 4294967168 }
  0x39   :  { %114 = vsyncpa [#allocation3], 1 }
  0x3a   :  { %115 = vsyncpa [#allocation6], 1 }
  0x3b   :  { %116 = vsyncpa [#allocation4], 1 }

</bundles_post_ra>
